<compile_context>
chip_gen: v5e
topology: v5e:2x2
jax: 0.10.0
libtpu: 0.0.40
codegen_flags: <defaults>
</compile_context>

<pallas_src>
import jax
import jax.numpy as jnp
from jax.experimental import pallas as pl
from jax.experimental.pallas import tpu as pltpu


_VMEM_LIMIT_BYTES = 56 * 1024 * 1024   # stays below v7x's 64 MiB physical VMEM
_VMEM_TILE_BUDGET = 40 * 1024 * 1024   # pipeline buffers + in-kernel intermediates


def _pick_tile_h(H, W, C, itemsize):
    """Largest H-tile such that 2 inputs x 2 pipeline buffers x C*TH*W*itemsize plus
    ~10 f32 (TH, W) intermediates stay under the VMEM budget.  Prefers multiples of
    8 (sublane alignment) that divide H exactly so the grid tiles H with no remainder."""
    per_row = 4 * C * W * itemsize + 40 * W
    cap = max(8, _VMEM_TILE_BUDGET // per_row)
    if H <= cap:
        return H
    best_mult8, best_any = 0, 1
    for th in range(1, min(H, cap) + 1):
        if H % th == 0:
            best_any = th
            if th % 8 == 0:
                best_mult8 = th
    return best_mult8 if best_mult8 else best_any


def _build_halos(f, g, TH, T):
    """(N, T, 2, W) f32: channel-summed difference rows just above / below each
    H-tile; zero where the tile touches the true image border (conv2d padding=1)."""
    N, C, H, W = f.shape
    f32 = jnp.float32
    t = jnp.arange(T)
    top_idx = jnp.clip(t * TH - 1, 0, H - 1)
    bot_idx = jnp.clip((t + 1) * TH, 0, H - 1)

    def rows_diff(idx):
        df = jnp.take(f, idx, axis=2).astype(f32) - jnp.take(g, idx, axis=2).astype(f32)
        return jnp.sum(df, axis=1)                                   # (N, T, W)

    top = jnp.where((t > 0)[None, :, None], rows_diff(top_idx), 0.0)
    bot = jnp.where((t < T - 1)[None, :, None], rows_diff(bot_idx), 0.0)
    return jnp.stack([top, bot], axis=2)                             # (N, T, 2, W)


def _loss_gradient_kernel(f_ref, g_ref, halo_ref, out_ref):
    # f_ref, g_ref : (1, C, TH, W) one H-tile of one batch element of each input.
    # halo_ref     : (1, 1, 2, W)  difference rows just above/below this tile.
    # out_ref      : (1, 1, 1, 1)  partial sum of |Sx(d)+Sy(d)| / 2 over the tile.
    _, C, TH, W = f_ref.shape
    f32 = jnp.float32

    # d = sum_c (fused_c - GT_c); the whole loss reduces to |Sx(d)+Sy(d)|/16.
    d = f_ref[0, 0].astype(f32) - g_ref[0, 0].astype(f32)
    for c in range(1, C):
        d = d + (f_ref[0, c].astype(f32) - g_ref[0, c].astype(f32))

    halo = halo_ref[0, 0].astype(f32)     # (2, W)
    top_halo = halo[0:1, :]               # row above the tile (zero at image top)
    bot_halo = halo[1:2, :]               # row below the tile (zero at image bottom)

    row = jax.lax.broadcasted_iota(jnp.int32, (TH, W), 0)
    col = jax.lax.broadcasted_iota(jnp.int32, (TH, W), 1)

    # Row-shifted planes via sublane rotation + halo patch (no padded plane copy).
    top = jnp.where(row == 0, top_halo, pltpu.roll(d, shift=1, axis=0))            # d[i-1]
    bot = jnp.where(row == TH - 1, bot_halo, pltpu.roll(d, shift=TH - 1, axis=0))  # d[i+1]

    # Fused separable stencil:
    #   Sx + Sy = 2 * ( (top+mid)[:, j+1] - (mid+bot)[:, j-1] + top - bot ),  mid = d.
    u = top + d
    w = d + bot
    u_r = jnp.where(col == W - 1, 0.0, pltpu.roll(u, shift=W - 1, axis=1))   # u[:, j+1]
    w_l = jnp.where(col == 0, 0.0, pltpu.roll(w, shift=1, axis=1))           # w[:, j-1]
    half_s = u_r - w_l + top - bot                                           # (Sx+Sy)/2

    # Two-stage reduction (lane axis, then sublane axis), keeping 2-D shapes.
    per_row = jnp.sum(jnp.abs(half_s), axis=1, keepdims=True)                # (TH, 1)
    out_ref[...] = jnp.sum(per_row, axis=0, keepdims=True).reshape(1, 1, 1, 1)


def loss_gradient(image_fused, GT):
    """L1(Sobelxy(image_fused), Sobelxy(GT)) with mean reduction; scalar f32."""
    assert image_fused.shape == GT.shape
    N, C, H, W = image_fused.shape
    assert C == 3, "Sobelxy weights in the reference module are fixed to 3 input channels"

    itemsize = jnp.dtype(image_fused.dtype).itemsize
    TH = _pick_tile_h(H, W, C, itemsize)
    T = H // TH

    halo = _build_halos(image_fused, GT, TH, T)            # (N, T, 2, W) f32

    cost = pl.CostEstimate(
        flops=int(20 * N * H * W),
        transcendentals=0,
        bytes_accessed=int(2 * N * C * H * W * itemsize + N * T * (2 * W + 1) * 4),
    )

    partial = pl.pallas_call(
        _loss_gradient_kernel,
        out_shape=jax.ShapeDtypeStruct((N, T, 1, 1), jnp.float32),
        grid_spec=pltpu.PrefetchScalarGridSpec(
            num_scalar_prefetch=0,
            grid=(N, T),
            in_specs=[
                pl.BlockSpec((1, C, TH, W), lambda n, h: (n, 0, h, 0)),
                pl.BlockSpec((1, C, TH, W), lambda n, h: (n, 0, h, 0)),
                pl.BlockSpec((1, 1, 2, W), lambda n, h: (n, h, 0, 0)),
            ],
            out_specs=pl.BlockSpec((1, 1, 1, 1), lambda n, h: (n, h, 0, 0)),
        ),
        compiler_params=pltpu.CompilerParams(
            dimension_semantics=("parallel", "parallel"),   # batch x H-tile, both TCs on v7x
            vmem_limit_bytes=_VMEM_LIMIT_BYTES,
        ),
        cost_estimate=cost,
    )(image_fused, GT, halo)

    # |grad_fused - grad_GT| = |Sx(d)+Sy(d)|/16 = |half_s|/8 ; l1_loss mean over (N,1,H,W).
    return jnp.sum(partial) / (8.0 * N * H * W)


def _reference_loss(image_fused, GT):
    """Pure-JAX reference mirroring the PyTorch module (conv2d cross-correlation)."""
    kx = jnp.array([[-1., 0., 1.], [-2., 0., 2.], [-1., 0., 1.]], jnp.float32)
    ky = jnp.array([[1., 2., 1.], [0., 0., 0.], [-1., -2., -1.]], jnp.float32)

    def sobelxy(x):
        x = x.astype(jnp.float32)
        c = x.shape[1]
        wx = jnp.tile(kx[None, None], (1, c, 1, 1))
        wy = jnp.tile(ky[None, None], (1, c, 1, 1))
        conv = lambda a, w: jax.lax.conv_general_dilated(
            a, w, (1, 1), ((1, 1), (1, 1)),
            dimension_numbers=("NCHW", "OIHW", "NCHW"),
            precision=jax.lax.Precision.HIGHEST)
        sx = (conv(x, wx) + 4.0) / 8.0
        sy = (conv(x, wy) + 4.0) / 8.0
        return 0.5 * sx + 0.5 * sy

    return jnp.mean(jnp.abs(sobelxy(image_fused) - sobelxy(GT)))


if __name__ == "__main__":
    key = jax.random.PRNGKey(0)
    k1, k2 = jax.random.split(key)
    # NCHW inputs; channels must be 3 (the Sobelxy weights are fixed 3-channel).
    image_fused = jax.random.uniform(k1, (2, 3, 16, 16), dtype=jnp.float32)
    GT = jax.random.uniform(k2, (2, 3, 16, 16), dtype=jnp.float32)

    out = jax.jit(loss_gradient)(image_fused, GT)
    out = jax.block_until_ready(out)

    ref = jax.block_until_ready(_reference_loss(image_fused, GT))
    err = abs(float(out) - float(ref))
    assert err <= 1e-4 * max(1.0, abs(float(ref))), (float(out), float(ref), err)

    _ = float(out)  # mirrors `.item()`-style scalar use of the loss
    print("KERNEL_OK")
</pallas_src>

<mosaic_0001>
module attributes {stable_mosaic.version = 11 : i64} {
  func.func @_loss_gradient_kernel(%arg0: i32, %arg1: i32, %arg2: memref<1x3x16x16xf32, #tpu.memory_space<vmem>>, %arg3: memref<1x3x16x16xf32, #tpu.memory_space<vmem>>, %arg4: memref<1x1x2x16xf32, #tpu.memory_space<vmem>>, %arg5: memref<1x1x1x1xf32, #tpu.memory_space<vmem>>) attributes {dimension_semantics = [#tpu.dimension_semantics<parallel>, #tpu.dimension_semantics<parallel>], iteration_bounds = array<i64: 2, 1>, scalar_prefetch = 0 : i64, scratch_operands = 0 : i64, tpu.core_type = #tpu.core_type<tc>, window_params = [{transform_indices = @transform_0, window_bounds = array<i64: 1, 3, 16, 16>}, {transform_indices = @transform_1, window_bounds = array<i64: 1, 3, 16, 16>}, {transform_indices = @transform_2, window_bounds = array<i64: 1, 1, 2, 16>}, {transform_indices = @transform_3, window_bounds = array<i64: 1, 1, 1, 1>}]} {
    %c0 = arith.constant 0 : index
    %c0_0 = arith.constant 0 : index
    %c0_1 = arith.constant 0 : index
    %c0_2 = arith.constant 0 : index
    %0 = vector.load %arg2[%c0, %c0_0, %c0_1, %c0_2] : memref<1x3x16x16xf32, #tpu.memory_space<vmem>>, vector<1x1x16x16xf32>
    %1 = vector.shape_cast %0 : vector<1x1x16x16xf32> to vector<16x16xf32>
    %c0_3 = arith.constant 0 : index
    %c0_4 = arith.constant 0 : index
    %c0_5 = arith.constant 0 : index
    %c0_6 = arith.constant 0 : index
    %2 = vector.load %arg3[%c0_3, %c0_4, %c0_5, %c0_6] : memref<1x3x16x16xf32, #tpu.memory_space<vmem>>, vector<1x1x16x16xf32>
    %3 = vector.shape_cast %2 : vector<1x1x16x16xf32> to vector<16x16xf32>
    %4 = arith.subf %1, %3 : vector<16x16xf32>
    %c0_7 = arith.constant 0 : index
    %c1 = arith.constant 1 : index
    %c0_8 = arith.constant 0 : index
    %c0_9 = arith.constant 0 : index
    %5 = vector.load %arg2[%c0_7, %c1, %c0_8, %c0_9] : memref<1x3x16x16xf32, #tpu.memory_space<vmem>>, vector<1x1x16x16xf32>
    %6 = vector.shape_cast %5 : vector<1x1x16x16xf32> to vector<16x16xf32>
    %c0_10 = arith.constant 0 : index
    %c1_11 = arith.constant 1 : index
    %c0_12 = arith.constant 0 : index
    %c0_13 = arith.constant 0 : index
    %7 = vector.load %arg3[%c0_10, %c1_11, %c0_12, %c0_13] : memref<1x3x16x16xf32, #tpu.memory_space<vmem>>, vector<1x1x16x16xf32>
    %8 = vector.shape_cast %7 : vector<1x1x16x16xf32> to vector<16x16xf32>
    %9 = arith.subf %6, %8 : vector<16x16xf32>
    %10 = arith.addf %4, %9 : vector<16x16xf32>
    %c0_14 = arith.constant 0 : index
    %c2 = arith.constant 2 : index
    %c0_15 = arith.constant 0 : index
    %c0_16 = arith.constant 0 : index
    %11 = vector.load %arg2[%c0_14, %c2, %c0_15, %c0_16] : memref<1x3x16x16xf32, #tpu.memory_space<vmem>>, vector<1x1x16x16xf32>
    %12 = vector.shape_cast %11 : vector<1x1x16x16xf32> to vector<16x16xf32>
    %c0_17 = arith.constant 0 : index
    %c2_18 = arith.constant 2 : index
    %c0_19 = arith.constant 0 : index
    %c0_20 = arith.constant 0 : index
    %13 = vector.load %arg3[%c0_17, %c2_18, %c0_19, %c0_20] : memref<1x3x16x16xf32, #tpu.memory_space<vmem>>, vector<1x1x16x16xf32>
    %14 = vector.shape_cast %13 : vector<1x1x16x16xf32> to vector<16x16xf32>
    %15 = arith.subf %12, %14 : vector<16x16xf32>
    %16 = arith.addf %10, %15 : vector<16x16xf32>
    %c0_21 = arith.constant 0 : index
    %c0_22 = arith.constant 0 : index
    %c0_23 = arith.constant 0 : index
    %c0_24 = arith.constant 0 : index
    %17 = vector.load %arg4[%c0_21, %c0_22, %c0_23, %c0_24] : memref<1x1x2x16xf32, #tpu.memory_space<vmem>>, vector<1x1x2x16xf32>
    %18 = vector.shape_cast %17 : vector<1x1x2x16xf32> to vector<2x16xf32>
    %19 = vector.extract_strided_slice %18 {offsets = [0, 0], sizes = [1, 16], strides = [1, 1]} : vector<2x16xf32> to vector<1x16xf32>
    %20 = vector.extract_strided_slice %18 {offsets = [1, 0], sizes = [1, 16], strides = [1, 1]} : vector<2x16xf32> to vector<1x16xf32>
    %21 = tpu.iota {dimensions = array<i32: 0>} : vector<16x16xi32>
    %22 = tpu.iota {dimensions = array<i32: 1>} : vector<16x16xi32>
    %c0_i32 = arith.constant 0 : i32
    %23 = vector.broadcast %c0_i32 : i32 to vector<16x16xi32>
    %24 = arith.cmpi eq, %21, %23 : vector<16x16xi32>
    %c1_i32 = arith.constant 1 : i32
    %25 = tpu.dynamic_rotate %16 by %c1_i32 dim 0 : vector<16x16xf32>, i32 -> vector<16x16xf32>
    %26 = vector.shape_cast %19 : vector<1x16xf32> to vector<1x16xf32>
    %27 = vector.broadcast %26 : vector<1x16xf32> to vector<16x16xf32>
    %28 = arith.select %24, %27, %25 : vector<16x16xi1>, vector<16x16xf32>
    %c15_i32 = arith.constant 15 : i32
    %29 = vector.broadcast %c15_i32 : i32 to vector<16x16xi32>
    %30 = arith.cmpi eq, %21, %29 : vector<16x16xi32>
    %c15_i32_25 = arith.constant 15 : i32
    %31 = tpu.dynamic_rotate %16 by %c15_i32_25 dim 0 : vector<16x16xf32>, i32 -> vector<16x16xf32>
    %32 = vector.shape_cast %20 : vector<1x16xf32> to vector<1x16xf32>
    %33 = vector.broadcast %32 : vector<1x16xf32> to vector<16x16xf32>
    %34 = arith.select %30, %33, %31 : vector<16x16xi1>, vector<16x16xf32>
    %35 = arith.addf %28, %16 : vector<16x16xf32>
    %36 = arith.addf %16, %34 : vector<16x16xf32>
    %c15_i32_26 = arith.constant 15 : i32
    %37 = vector.broadcast %c15_i32_26 : i32 to vector<16x16xi32>
    %38 = arith.cmpi eq, %22, %37 : vector<16x16xi32>
    %c15_i32_27 = arith.constant 15 : i32
    %39 = tpu.dynamic_rotate %35 by %c15_i32_27 dim 1 : vector<16x16xf32>, i32 -> vector<16x16xf32>
    %cst = arith.constant 0.000000e+00 : f32
    %40 = vector.broadcast %cst : f32 to vector<16x16xf32>
    %41 = arith.select %38, %40, %39 : vector<16x16xi1>, vector<16x16xf32>
    %c0_i32_28 = arith.constant 0 : i32
    %42 = vector.broadcast %c0_i32_28 : i32 to vector<16x16xi32>
    %43 = arith.cmpi eq, %22, %42 : vector<16x16xi32>
    %c1_i32_29 = arith.constant 1 : i32
    %44 = tpu.dynamic_rotate %36 by %c1_i32_29 dim 1 : vector<16x16xf32>, i32 -> vector<16x16xf32>
    %cst_30 = arith.constant 0.000000e+00 : f32
    %45 = vector.broadcast %cst_30 : f32 to vector<16x16xf32>
    %46 = arith.select %43, %45, %44 : vector<16x16xi1>, vector<16x16xf32>
    %47 = arith.subf %41, %46 : vector<16x16xf32>
    %48 = arith.addf %47, %28 : vector<16x16xf32>
    %49 = arith.subf %48, %34 : vector<16x16xf32>
    %50 = math.absf %49 : vector<16x16xf32>
    %cst_31 = arith.constant dense<0.000000e+00> : vector<16xf32>
    %51 = vector.multi_reduction <add>, %50, %cst_31 [1] : vector<16x16xf32> to vector<16xf32>
    %52 = vector.shape_cast %51 : vector<16xf32> to vector<16x1xf32>
    %cst_32 = arith.constant dense<0.000000e+00> : vector<1xf32>
    %53 = vector.multi_reduction <add>, %52, %cst_32 [0] : vector<16x1xf32> to vector<1xf32>
    %54 = vector.shape_cast %53 : vector<1xf32> to vector<1x1xf32>
    %55 = vector.shape_cast %54 : vector<1x1xf32> to vector<1x1x1x1xf32>
    %c0_33 = arith.constant 0 : index
    %c0_34 = arith.constant 0 : index
    %c0_35 = arith.constant 0 : index
    %c0_36 = arith.constant 0 : index
    %56 = vector.load %arg5[%c0_33, %c0_34, %c0_35, %c0_36] : memref<1x1x1x1xf32, #tpu.memory_space<vmem>>, vector<1x1x1x1xf32>
    tpu.vector_store %arg5[%c0_33, %c0_34, %c0_35, %c0_36], %55 {strides = array<i32>} : memref<1x1x1x1xf32, #tpu.memory_space<vmem>>, vector<1x1x1x1xf32>,
    return
  }
  func.func @transform_0(%arg0: i32, %arg1: i32) -> (i32, i32, i32, i32) {
    %c0_i32 = arith.constant 0 : i32
    %c0_i32_0 = arith.constant 0 : i32
    %c0_i32_1 = arith.constant 0 : i32
    return %arg0, %c0_i32, %arg1, %c0_i32_0 : i32, i32, i32, i32
  }
  func.func @transform_1(%arg0: i32, %arg1: i32) -> (i32, i32, i32, i32) {
    %c0_i32 = arith.constant 0 : i32
    %c0_i32_0 = arith.constant 0 : i32
    %c0_i32_1 = arith.constant 0 : i32
    return %arg0, %c0_i32, %arg1, %c0_i32_0 : i32, i32, i32, i32
  }
  func.func @transform_2(%arg0: i32, %arg1: i32) -> (i32, i32, i32, i32) {
    %c0_i32 = arith.constant 0 : i32
    %c0_i32_0 = arith.constant 0 : i32
    %c0_i32_1 = arith.constant 0 : i32
    return %arg0, %arg1, %c0_i32, %c0_i32_0 : i32, i32, i32, i32
  }
  func.func @transform_3(%arg0: i32, %arg1: i32) -> (i32, i32, i32, i32) {
    %c0_i32 = arith.constant 0 : i32
    %c0_i32_0 = arith.constant 0 : i32
    %c0_i32_1 = arith.constant 0 : i32
    return %arg0, %arg1, %c0_i32, %c0_i32_0 : i32, i32, i32, i32
  }
}

</mosaic_0001>

<bundles_post_ra>
// kernel: loss_gradient.1
= control target key start
LH: loop header
LB: loop body
LE: loop exit
PB: predicated region body
PF: predicated region fallthrough
CT: control target
= control target key end

     0   :  { %8 = vsyncpa [#allocation3], 0  ;;  %s891_s0 = inlined_call_operand.hbm [shape: f32[2,3,16,16], index: 0, kind: input, shape index: {}]   ;;  %s892_s1 = inlined_call_operand.hbm [shape: f32[2,3,16,16], index: 1, kind: input, shape index: {}]   ;;  %s893_s2 = inlined_call_operand.vmem [shape: f32[2,1,2,16], index: 2, kind: input, shape index: {}]   ;;  %s894_s3 = inlined_call_operand.vmem [shape: f32[2,1,1,1], index: 3, kind: output, shape index: {}]  }
   0x1   :  { %10 = vsyncpa [#allocation3 + $0x1], 0 }
   0x2   :  { %11 = vsyncpa [#allocation5], 0 }
   0x3   :  { %13 = vsyncpa [#allocation5 + $0x1], 0  ;;  %s766_s12 = smov 0   ;;  %s768_s13 = smov 0  }
   0x4   :  { %s770_s14 = smov 0   ;;  %s772_s15 = smov 0  }
   0x5   :  { %s774_s16 = smov 0   ;;  %s776_s17 = smov 0  }
   0x6 LB: > { %s537_s18 = sadd.s32 4294967295, %s739_s17   ;;  %s31_s19 = sadd.s32 1, %s735_s16  ;;  %s739_s17 = sphi %s776_s17, %s19_s17   ;;  %s735_s16 = sphi %s774_s16, %s901_s16   ;;  %s731_s15 = sphi %s772_s15, %s900_s15   ;;  %s727_s14 = sphi %s770_s14, %s899_s14   ;;  %s723_s13 = sphi %s768_s13, %s898_s13   ;;  %s719_s12 = sphi %s766_s12, %s897_s12  }
   0x7   : > { %p33_p0 = scmp.ge.s32.totalorder %s31_s19, 2  ;;  %s40_s20 = sadd.s32 1, %s727_s14 }
   0x8   : > { %p47_p1 = scmp.ne.s32.totalorder %s727_s14, %s723_s13  ;;  %p48_p2 = scmp.eq.s32.totalorder %s739_s17, 0 }
   0x9   : > { %s903_s19 = smov (%p33_p0, %s31_s19), 0  ;;  %p53_p4 = scmp.ne.s32.totalorder %s723_s13, %s719_s12 }
   0xa   : > { %p49_p3 = por %p48_p2, %p47_p1  ;;  %s35_s21 = ssub.s32 %s735_s16, %s903_s19 }
   0xb   : > { %p54_p5 = scmp.eq.s32.totalorder %s537_s18, 0  ;;  %p38_p6 = scmp.eq.s32.totalorder %s35_s21, 0 }
   0xc   : > { %p571_p8 = scmp.lt.s32.totalorder %s739_s17, 2  ;;  %s814_s24 = sand.u32 1, %s727_s14  }
   0xd   : > { %p805_p7 = por %p54_p5, %p53_p4  ;;  %s556_s25 = smul.u32 48, %s735_s16 }
   0xe   : > { %s811_s23 = scalar_select %p38_p6, %s727_s14, %s40_s20  }
   0xf   : > { %s555_s26 = smul.u32 48, %s814_s24  ;;  %s172_s29 = scalar_lea.hbm %s891_s0, %s556_s25 }
  0x10   : > { %p821_p9 = pnand %p571_p8, %p49_p3  ;;  %s173_s4 = sshll.u32 %s172_s29, 4  ;;  %s174_s4 = int_to_ptr.hbm [resolvable:$true] %s173_s4 }
  0x11   : > { %s165_s5 = scalar_lea.vmem [#allocation2], %s555_s26  ;;  %s162_s7 = scalar_lea.sflag [#allocation3], %s814_s24 }
  0x12   : > { %s175_s6 = sshll.u32 %s165_s5, 4  ;;  %s741_s8 = smov 128   ;;  %s176_s6 = int_to_ptr.vmem [resolvable:$true] %s175_s6 }
  0x13   : > { %s742_s9 = smov 8   ;;  %p543_p10 = scmp.ge.s32.totalorder %s739_s17, 1 }
  0x14   : > { %567 = dma.hbm_to_vmem [thread:$0]  (!%p821_p9), %s174_s4, 768, %s176_s6, %s162_s7, %s741_s8, %s741_s8, %s742_s9  }
  0x15   : > { %p217_p11 = scmp.lt.s32.totalorder %s739_s17, 3  ;;  %s196_s12 = scalar_lea.hbm %s892_s1, %s556_s25 }
  0x16   : > { %s197_s18 = sshll.u32 %s196_s12, 4  ;;  %s189_s20 = scalar_lea.vmem [#allocation4], %s555_s26  ;;  %s198_s18 = int_to_ptr.hbm [resolvable:$true] %s197_s18 }
  0x17   : > { %p218_p12 = pnand %p543_p10, %p217_p11  ;;  %s199_s21 = sshll.u32 %s189_s20, 4  ;;  %s200_s21 = int_to_ptr.vmem [resolvable:$true] %s199_s21 }
  0x18   : > { %s186_s27 = scalar_lea.sflag [#allocation5], %s814_s24  ;;  %s223_s28 = sand.u32 (!%p218_p12), 1, %s723_s13  }
  0x19   : > { %570 = dma.hbm_to_vmem [thread:$0]  (!%p821_p9), %s198_s18, 768, %s200_s21, %s186_s27, %s741_s8, %s741_s8, %s742_s9  }
  0x1a   : > { %221 = sbr.rel (%p218_p12) target bundleno = 537 (0x219), region = 32  ;;  %s224_s4 = scalar_lea.sflag (!%p218_p12), [#allocation3], %s223_s28 }
  0x1b   : > { %s559_s29 = smul.u32 (!%p218_p12), 48, %s223_s28 }
  0x1d   : > { %s227_s5 = scalar_lea.vmem (!%p218_p12), [#allocation2], %s559_s29 }
  0x1f   : > { %710 = dma.done.wait (%p805_p7), %s224_s4, 768  }
  0x20   : > { %712 = vsyncadd (%p805_p7), %s224_s4, 4294966528  ;;  %s234_s25 = scalar_lea.sflag [#allocation5], %s223_s28  ;;  %s237_s26 = scalar_lea.vmem [#allocation4], %s559_s29 }
  0x21   : > { %714 = dma.done.wait (%p805_p7), %s234_s25, 768  }
  0x22   : > { %716 = vsyncadd (%p805_p7), %s234_s25, 4294966528  ;;  %p276_p13 = scmp.lt.s32.totalorder %s731_s15, 1  ;;  %v316_v0 = vlaneseq  ;;  %v289_v1 = vld [vmem:[%s227_s5] sm:$0xff]  ;;  %v290_v2 = vld [vmem:[%s227_s5 + $0x8] sm:$0xff]  ;;  %s743_s7 = smov 16   ;;  %vm346_vm4 = vcmask 1047680  }
  0x23   : > { %v291_v3 = vld [vmem:[%s237_s26] sm:$0xff]  ;;  %v292_v4 = vld [vmem:[%s237_s26 + $0x8] sm:$0xff]  ;;  %v545_v6 = vld [vmem:[%s227_s5 + $0x10] sm:$0xff]  ;;  %s744_s8 = smov 127   ;;  %s745_s9 = smov 113   ;;  %vm400_vm7 = vcmask 130048  }
  0x24   : > { %s905_s15 = smov (!%p276_p13, %s731_s15), 1  ;;  %v293_v5 = vsub.f32 %v289_v1, %v291_v3  ;;  %v546_v7 = vld [vmem:[%s227_s5 + $0x18] sm:$0xff]  ;;  %v294_v8 = vsub.f32 %v290_v2, %v292_v4  ;;  %v547_v9 = vld [vmem:[%s237_s26 + $0x10] sm:$0xff]  ;;  %v549_v11 = vld [vmem:[%s227_s5 + $0x20] sm:$0xff]  ;;  %v317_v17 = vshrl.u32 %v316_v0, 7  ;;  %v320_v59 = vand.u32 127, %v316_v0 }
  0x25   : > { %s544_s24 = sshll.u32 %s905_s15, 1  ;;  %v548_v10 = vld [vmem:[%s237_s26 + $0x18] sm:$0xff]  ;;  %v301_v12 = vsub.f32 %v545_v6, %v547_v9  ;;  %v550_v14 = vld [vmem:[%s227_s5 + $0x28] sm:$0xff]  ;;  %v551_v15 = vld [vmem:[%s237_s26 + $0x20] sm:$0xff]  ;;  %s288_s12 = scalar_lea.vmem %s894_s3, %s905_s15  ;;  %vm414_vm8 = vcmask 0  }
  0x26   : > { %s282_s6 = scalar_lea.vmem %s893_s2, %s544_s24  ;;  %v302_v13 = vsub.f32 %v546_v7, %v548_v10  ;;  %v552_v16 = vld [vmem:[%s237_s26 + $0x28] sm:$0xff]  ;;  %v311_v18 = vsub.f32 %v549_v11, %v551_v15  ;;  %vm335_vm0 = vcmp.lt.s32.totalorder %v317_v17, 7  ;;  %vm321_vm1 = vcmp.eq.s32.totalorder %v317_v17, 0 }
  0x27   : > { %v312_v19 = vsub.f32 %v550_v14, %v552_v16  ;;  %v303_v20 = vadd.f32 %v301_v12, %v293_v5  ;;  %v315_v22 = vld [vmem:[%s282_s6] sm:$0x3]  ;;  %vm325_vm2 = vcmp.lt.s32.totalorder %v317_v17, 1  ;;  %v318_v26 = vadd.s32 8, %v317_v17 }
  0x28   : > { %v304_v21 = vadd.f32 %v302_v13, %v294_v8  ;;  %v328_v25 = vperm.slane %v315_v22, 0  ;;  %v338_v33 = vperm.slane %v315_v22, 1  ;;  %vm369_vm5 = vcmp.eq.s32.totalorder %v320_v59, 0 }
  0x29   : > { %v313_v23 = vadd.f32 %v311_v18, %v303_v20  ;;  %vm332_vm3 = vcmp.eq.s32.totalorder %v318_v26, 15  ;;  %vm345_vm6 = vcmp.eq.s32.totalorder %v320_v59, 15 }
  0x2a   : > { %v314_v24 = vadd.f32 %v312_v19, %v304_v21 }
  0x2b   : > { %v333_v27 = vrot.slane %v313_v23, 1  ;;  %v323_v29 = vrot.slane %v313_v23, 7 }
  0x2c   : > { %v334_v28 = vrot.slane %v314_v24, 1  ;;  %v324_v30 = vrot.slane %v314_v24, 7 }
  0x2e   : > { %v854_v31 = vsel %vm335_vm0, %v333_v27, %v334_v28  ;;  %v327_v32 = vsel %vm325_vm2, %v324_v30, %v323_v29  ;;  %v337_v36 = vsel %vm335_vm0, %v334_v28, %v333_v27  ;;  %v326_v39 = vsel %vm325_vm2, %v323_v29, %v324_v30 }
  0x2f   : > { %v343_v34 = vadd.f32 %v854_v31, %v313_v23  ;;  %v329_v35 = vsel %vm321_vm1, %v328_v25, %v327_v32  ;;  %v340_v38 = vsel %vm332_vm3, %v338_v33, %v337_v36  ;;  %v342_v41 = vadd.f32 %v326_v39, %v314_v24 }
  0x30   : > { %v341_v37 = vadd.f32 %v329_v35, %v313_v23  ;;  %v344_v40 = vadd.f32 %v340_v38, %v314_v24 }
  0x31   : > { %370 = vrot.lane.b32.xlu1 %v343_v34, %s743_s7 }
  0x32   : > { %347 = vrot.lane.b32.xlu0 %v341_v37, %s743_s7 }
  0x39   : > { %373 = vrot.lane.b32.xlu1 %v344_v40, %s743_s7 }
  0x3a   : > { %350 = vrot.lane.b32.xlu0 %v342_v41, %s743_s7 }
  0xa3   : > { %v371_v42 = vpop.permute.xlu1 %370 }
  0xa4   : > { %v372_v43 = vsel %vm346_vm4, %v371_v42, %v343_v34  ;;  %v348_v44 = vpop.permute.xlu0 %347 }
  0xa5   : > { %376 = vrot.lane.b32.xlu0 %v372_v43, %s743_s7  ;;  %v349_v45 = vsel %vm346_vm4, %v348_v44, %v341_v37 }
  0xa6   : > { %353 = vrot.lane.b32.xlu2 %v349_v45, %s743_s7 }
  0xab   : > { %v374_v46 = vpop.permute.xlu1 %373 }
  0xac   : > { %v351_v47 = vpop.permute.xlu0 %350  ;;  %v375_v48 = vsel %vm346_vm4, %v374_v46, %v344_v40 }
  0xad   : > { %378 = vrot.lane.b32.xlu1 %v375_v48, %s743_s7  ;;  %v352_v49 = vsel %vm346_vm4, %v351_v47, %v342_v41 }
  0xae   : > { %355 = vrot.lane.b32.xlu2 %v352_v49, %s743_s7 }
 0x100   : > { %v354_v50 = vpop.permute.xlu2 %353 }
 0x101   : > { %v357_v51 = vsel %vm346_vm4, %v354_v50, %v341_v37 }
 0x102   : > { %361 = vrot.lane.b32.xlu2 %v357_v51, %s744_s8 }
 0x108   : > { %v356_v52 = vpop.permute.xlu2 %355 }
 0x109   : > { %v358_v53 = vsel %vm346_vm4, %v356_v52, %v342_v41 }
 0x10a   : > { %363 = vrot.lane.b32.xlu0 %v358_v53, %s744_s8 }
 0x117   : > { %v377_v54 = vpop.permute.xlu0 %376 }
 0x118   : > { %v380_v55 = vsel %vm346_vm4, %v377_v54, %v343_v34 }
 0x119   : > { %384 = vrot.lane.b32.xlu1 %v380_v55, %s745_s9 }
 0x11f   : > { %v379_v56 = vpop.permute.xlu1 %378 }
 0x120   : > { %v381_v57 = vsel %vm346_vm4, %v379_v56, %v344_v40 }
 0x121   : > { %386 = vrot.lane.b32.xlu2 %v381_v57, %s745_s9 }
 0x15c   : > { %v362_v58 = vpop.permute.xlu2 %361 }
 0x15d   : > { %v367_v7 = vsel %vm345_vm6, 0.0, %v362_v58 }
 0x17b   : > { %v387_v60 = vpop.permute.xlu2 %386 }
 0x17c   : > { %v391_v61 = vsel %vm369_vm5, 0.0, %v387_v60  ;;  %v364_v62 = vpop.permute.xlu0 %363 }
 0x17d   : > { %v368_v63 = vsel %vm345_vm6, 0.0, %v364_v62 }
 0x17e   : > { %v393_v1 = vsub.f32 %v368_v63, %v391_v61 }
 0x180   : > { %v395_v2 = vadd.f32 %v393_v1, %v326_v39 }
 0x182   : > { %v397_v3 = vsub.f32 %v395_v2, %v340_v38 }
 0x184   : > { %v399_v4 = vand.u32 2147483647, %v397_v3 }
 0x186   : > { %v404_v5 = vsel %vm400_vm7, %v399_v4, 0.0 }
 0x187   : > { %405 = vadd.xlane.f32.xlu1 %v404_v5 }
 0x18b   : > { %v385_v6 = vpop.permute.xlu1 %384 }
 0x18c   : > { %v390_v8 = vsel %vm369_vm5, 0.0, %v385_v6 }
 0x18d   : > { %v392_v9 = vsub.f32 %v367_v7, %v390_v8 }
 0x18f   : > { %v394_v10 = vadd.f32 %v392_v9, %v329_v35 }
 0x191   : > { %v396_v0 = vsub.f32 %v394_v10, %v854_v31 }
 0x193   : > { %v398_v11 = vand.u32 2147483647, %v396_v0 }
 0x195   : > { %v401_v12 = vsel %vm400_vm7, %v398_v11, 0.0 }
 0x196   : > { %402 = vadd.xlane.f32.xlu0 %v401_v12 }
 0x1fa   : > { %v406_v13 = vpop.xlane.xlu1 %405 }
 0x209   : > { %v403_v14 = vpop.xlane.xlu0 %402 }
 0x20a   : > { %v407_v15 = vadd.f32 %v406_v13, %v403_v14 }
 0x20c   : > { %v408_v16 = vrot.slane %v407_v15, 4 }
 0x20e   : > { %v409_v17 = vadd.f32 %v408_v16, %v407_v15 }
 0x210   : > { %v410_v18 = vrot.slane %v409_v17, 2 }
 0x212   : > { %v411_v19 = vadd.f32 %v410_v18, %v409_v17 }
 0x214   : > { %v412_v20 = vrot.slane %v411_v19, 1 }
 0x216   : > { %v413_v21 = vadd.f32 %v412_v20, %v411_v19 }
 0x218   : > { %415 = vst.msk [vmem:[%s288_s12] sm:$0x1] %vm414_vm8, %v413_v21 }
 0x219 PF: > { %s19_s17 = sadd.s32 1, %s739_s17   ;;  %s897_s12 = smov %s723_s13 }
 0x21a   : > { %p16_p0 = scmp.ge.s32.totalorder %s19_s17, 4   ;;  %s898_s13 = smov %s727_s14 }
 0x21b   : > { %s899_s14 = smov %s811_s23  ;;  %s900_s15 = smov %s735_s16 }
 0x21c   : > { %s901_s16 = smov %s903_s19  ;;  %18 = sbr.rel (!%p16_p0) target bundleno = 6 (0x6), region = 92 }
 0x221   :  { %439 = vsyncpa [#allocation3], 1 }
 0x222   :  { %441 = vsyncpa [#allocation3 + $0x1], 1 }
 0x223   :  { %442 = vsyncpa [#allocation5], 1 }
 0x224   :  { %444 = vsyncpa [#allocation5 + $0x1], 1 }

</bundles_post_ra>
